<compile_context>
chip_gen: v5e
topology: v5e:2x2
jax: 0.10.0
libtpu: 0.0.40
codegen_flags: <defaults>
</compile_context>

<pallas_src>
import functools

import jax
import jax.numpy as jnp
from jax.experimental import pallas as pl
from jax.experimental.pallas import tpu as pltpu


def _round_up(x, m):
    return ((x + m - 1) // m) * m


def _vmem_capacity_bytes():
    """Per-core VMEM capacity; falls back to the smallest (v7x, 64 MiB)."""
    try:
        cap = int(getattr(pltpu.get_tpu_info(), "vmem_capacity_bytes"))
        if cap > 0:
            return cap
    except Exception:
        pass
    return 64 * 1024 * 1024


def _conv_maxpool_linear_kernel(x_ref, w_conv_ref, b_conv_ref,
                                w_lin_ref, b_lin_ref, out_ref,
                                *, ks, c_out, l_valid):
    """Grouped Conv2d (collapsed to a seq-dim 1-D conv) + max-pool + Linear.

    x_ref      : (B_blk, S_pad, D)  activations (bf16 or f32)
    w_conv_ref : (D, N_lanes)       packed conv filters, column k*C_out + c
    b_conv_ref : (1, N_lanes)       conv bias (f32, zero-padded)
    w_lin_ref  : (N_lanes, N_pad)   hidden_to_softmax weight^T (f32); rows
                                    >= C_out are exactly zero (nulls roll junk)
    b_lin_ref  : (1, N_pad)         hidden_to_softmax bias (f32, zero-padded)
    out_ref    : (B_blk, N_pad)     pre_softmax logits (f32, lane-padded)
    """
    b_blk, s_pad, d = x_ref.shape
    n_lanes = w_conv_ref.shape[1]
    m2 = b_blk * s_pad

    # ONE MXU matmul over every (shift k, output channel c) packed into a
    # single lane block (no zero-padded columns between groups).
    proj = jnp.dot(x_ref[...].reshape(m2, d), w_conv_ref[...],
                   preferred_element_type=jnp.float32)          # (B_blk*S_pad, N_lanes)

    # conv[b, t, c] = sum_k proj[b, t + k, k*C_out + c]
    # Realize the (seq, lane-group) offset of group k with two XLU rolls.
    # (pltpu.roll follows jnp.roll semantics; non-negative shifts used.)
    acc = proj
    for k in range(1, ks):                                      # static unroll
        shifted = pltpu.roll(proj, (m2 - k) % m2, 0)            # rows: t -> t+k
        shifted = pltpu.roll(shifted, (n_lanes - k * c_out) % n_lanes, 1)
        acc = acc + shifted

    acc = acc.reshape(b_blk, s_pad, n_lanes)
    # Only t < L are valid conv positions; mask roll wrap-around / padded rows.
    t_idx = jax.lax.broadcasted_iota(jnp.int32, (b_blk, s_pad, n_lanes), 1)
    acc = jnp.where(t_idx < l_valid, acc, -jnp.inf)

    # torch.max(conv_out, dim=2); the per-channel bias commutes with the max,
    # so add it to the pooled (B_blk, N_lanes) slab instead of the full one.
    pooled = jnp.max(acc, axis=1) + b_conv_ref[...]             # (B_blk, N_lanes)

    # Lanes >= C_out of `pooled` hold roll wrap-around junk; the zero rows of
    # w_lin null them here.
    out = jnp.dot(pooled, w_lin_ref[...],
                  preferred_element_type=jnp.float32) + b_lin_ref[...]
    out_ref[...] = out.astype(out_ref.dtype)


def bert_conv_head(hidden_layer_bsd, params, *, cnn1_ks, n_class,
                   compute_dtype=jnp.bfloat16, batch_block=None):
    """hidden_layer_bsd: (B, S, D) selected BERT hidden layer (batch-first)."""
    B, S, D = hidden_layer_bsd.shape
    w_conv = params["w_conv"]                         # (C_out, 1, KS, D)
    c_out = w_conv.shape[0]
    ks = cnn1_ks
    assert w_conv.shape == (c_out, 1, ks, D)
    assert S >= ks
    l_valid = S - ks + 1

    n_lanes = _round_up(ks * c_out, 128)              # packed conv columns
    n_pad = _round_up(n_class, 128)                   # lane-dense output stores

    # Packed conv weight slab: column k*C_out + c holds W[c, 0, k, :].
    w = jnp.transpose(w_conv[:, 0, :, :], (2, 1, 0)).reshape(D, ks * c_out)
    w_slab = jnp.pad(w, ((0, 0), (0, n_lanes - ks * c_out))).astype(compute_dtype)

    b_conv = jnp.pad(params["b_conv"], (0, n_lanes - c_out))
    b_conv = b_conv.reshape(1, n_lanes).astype(jnp.float32)

    # Rows >= C_out MUST stay exactly zero (null the roll wrap-around lanes).
    w_lin = jnp.pad(params["w_lin"].T,
                    ((0, n_lanes - c_out), (0, n_pad - n_class))).astype(jnp.float32)
    b_lin = jnp.pad(params["b_lin"], (0, n_pad - n_class))
    b_lin = b_lin.reshape(1, n_pad).astype(jnp.float32)

    itemsize = jnp.dtype(compute_dtype).itemsize
    s_pad = _round_up(S, 8)          # keep the in-kernel (M,N)->(B,S,N) reshape tile-aligned

    # ---- batch tile sizing from the chip's VMEM capacity --------------------
    vmem_cap = _vmem_capacity_bytes()
    vmem_budget = int(vmem_cap * 0.6)                 # headroom for compiler scratch
    bytes_per_row = (2 * s_pad * D * itemsize         # double-buffered x block
                     + 3 * s_pad * n_lanes * 4)       # f32 proj / rolled / acc temps
    fixed_bytes = (2 * (D * n_lanes * itemsize
                        + (n_lanes + n_lanes * n_pad + n_pad) * 4)
                   + 2 * 8 * n_pad * 4)
    b_blk = max(0, vmem_budget - fixed_bytes) // max(bytes_per_row, 1)
    b_blk = max(8, min(256, (b_blk // 8) * 8))
    if b_blk >= 32:
        b_blk = (b_blk // 32) * 32                    # M = b_blk*S_pad multiple of 256
    if batch_block is not None:
        b_blk = max(8, (int(batch_block) // 8) * 8)
    if B > 8:                                         # keep >=2 grid steps (v7x dual-TC)
        b_blk = min(b_blk, _round_up((B + 1) // 2, 8))

    b_padded = _round_up(B, b_blk)
    x = hidden_layer_bsd.astype(compute_dtype)
    if b_padded != B or s_pad != S:
        x = jnp.pad(x, ((0, b_padded - B), (0, s_pad - S), (0, 0)))

    grid = (b_padded // b_blk,)

    cost = pl.CostEstimate(
        flops=2 * b_padded * s_pad * D * n_lanes + 2 * b_padded * n_lanes * n_pad,
        transcendentals=0,
        bytes_accessed=(x.size * itemsize + w_slab.size * itemsize
                        + (b_conv.size + w_lin.size + b_lin.size) * 4
                        + b_padded * n_pad * 4),
    )

    kernel = functools.partial(_conv_maxpool_linear_kernel,
                               ks=ks, c_out=c_out, l_valid=l_valid)

    out = pl.pallas_call(
        kernel,
        out_shape=jax.ShapeDtypeStruct((b_padded, n_pad), jnp.float32),
        grid=grid,
        in_specs=[
            pl.BlockSpec((b_blk, s_pad, D), lambda b: (b, 0, 0)),   # activations
            pl.BlockSpec((D, n_lanes), lambda b: (0, 0)),           # packed conv weights
            pl.BlockSpec((1, n_lanes), lambda b: (0, 0)),           # conv bias
            pl.BlockSpec((n_lanes, n_pad), lambda b: (0, 0)),       # linear weight^T
            pl.BlockSpec((1, n_pad), lambda b: (0, 0)),             # linear bias
        ],
        out_specs=pl.BlockSpec((b_blk, n_pad), lambda b: (b, 0)),
        compiler_params=pltpu.CompilerParams(
            dimension_semantics=("parallel",),
            vmem_limit_bytes=max(32 * 1024 * 1024,
                                 min(112 * 1024 * 1024, int(vmem_cap * 0.85))),
        ),
        cost_estimate=cost,
    )(x, w_slab, b_conv, w_lin, b_lin)

    return out[:B, :n_class]


def init_params(key, bert_hidden, num_hidden_layers, cnn1_ks, out_channel, n_class):
    """Deterministic init mirroring the PyTorch module's parameter shapes."""
    D = bert_hidden
    c_out = num_hidden_layers * out_channel
    ks = cnn1_ks
    k0, k1, k2, k3 = jax.random.split(key, 4)

    def u(k, shape, bound):
        return jax.random.uniform(k, shape, jnp.float32, -bound, bound)

    conv_bound = 1.0 / float((1 * ks * D) ** 0.5)   # fan_in = (in/groups)*KS*D
    lin_bound = 1.0 / float(c_out ** 0.5)

    return {
        "w_conv": u(k0, (c_out, 1, ks, D), conv_bound),   # Conv2d weight
        "b_conv": u(k1, (c_out,), conv_bound),            # Conv2d bias
        "w_lin": u(k2, (n_class, c_out), lin_bound),      # hidden_to_softmax.weight
        "b_lin": u(k3, (n_class,), lin_bound),            # hidden_to_softmax.bias
    }


def reference_forward(hidden_layer_bsd, params, *, cnn1_ks):
    """Pure-jnp mirror of the PyTorch forward (post-BERT part)."""
    x = hidden_layer_bsd.astype(jnp.float32)
    B, S, D = x.shape
    W = params["w_conv"][:, 0]                     # (C_out, KS, D)
    ks = cnn1_ks
    L = S - ks + 1
    acc = jnp.zeros((B, W.shape[0], L), jnp.float32)
    for k in range(ks):
        acc = acc + jnp.einsum("bld,cd->bcl", x[:, k:k + L, :], W[:, k, :])
    conv = acc + params["b_conv"][None, :, None]   # (B, C_out, L)
    pooled = jnp.max(conv, axis=2)                 # (B, C_out)
    return pooled @ params["w_lin"].T + params["b_lin"]


if __name__ == "__main__":
    # Small shapes consistent with the module's forward:
    #   C_out = num_hidden_layers * out_channel = 12, kernel (CNN1_KS, D).
    B, S, D = 16, 16, 32
    num_hidden_layers = 12
    out_channel = 1
    cnn1_ks = 3
    n_class = 4

    key = jax.random.PRNGKey(0)
    k_x, k_p = jax.random.split(key)

    # Stand-in for encoded_layers[2][BERT_layer_value] (batch, seq, hidden).
    hidden_layer = jax.random.normal(k_x, (B, S, D), dtype=jnp.float32)
    params = init_params(k_p, D, num_hidden_layers, cnn1_ks, out_channel, n_class)

    ref = reference_forward(hidden_layer, params, cnn1_ks=cnn1_ks)

    # f32 path (matches the PyTorch math up to summation order).
    fn_f32 = jax.jit(functools.partial(bert_conv_head, cnn1_ks=cnn1_ks,
                                       n_class=n_class,
                                       compute_dtype=jnp.float32))
    out_f32 = fn_f32(hidden_layer, params)
    jax.block_until_ready(out_f32)
    assert out_f32.shape == (B, n_class)
    assert jnp.allclose(out_f32, ref, rtol=2e-2, atol=2e-2), "f32 mismatch"

    # bf16-input / f32-accumulate path (recommended production setting).
    fn_bf16 = jax.jit(functools.partial(bert_conv_head, cnn1_ks=cnn1_ks,
                                        n_class=n_class,
                                        compute_dtype=jnp.bfloat16))
    out_bf16 = fn_bf16(hidden_layer, params)
    jax.block_until_ready(out_bf16)
    assert out_bf16.shape == (B, n_class)
    assert jnp.allclose(out_bf16, ref, rtol=2e-1, atol=2e-1), "bf16 mismatch"

    print("KERNEL_OK")
</pallas_src>

<mosaic_0001>
module attributes {stable_mosaic.version = 11 : i64} {
  func.func @_conv_maxpool_linear_kernel(%arg0: i32, %arg1: memref<8x16x32xf32, #tpu.memory_space<vmem>>, %arg2: memref<32x128xf32, #tpu.memory_space<vmem>>, %arg3: memref<1x128xf32, #tpu.memory_space<vmem>>, %arg4: memref<128x128xf32, #tpu.memory_space<vmem>>, %arg5: memref<1x128xf32, #tpu.memory_space<vmem>>, %arg6: memref<8x128xf32, #tpu.memory_space<vmem>>) attributes {dimension_semantics = [#tpu.dimension_semantics<parallel>], iteration_bounds = array<i64: 2>, scalar_prefetch = 0 : i64, scratch_operands = 0 : i64, tpu.core_type = #tpu.core_type<tc>, window_params = [{transform_indices = @transform_0, window_bounds = array<i64: 8, 16, 32>}, {pipeline_mode = #tpu.pipeline_mode<synchronous>, transform_indices = @transform_1, window_bounds = array<i64: 32, 128>}, {pipeline_mode = #tpu.pipeline_mode<synchronous>, transform_indices = @transform_2, window_bounds = array<i64: 1, 128>}, {pipeline_mode = #tpu.pipeline_mode<synchronous>, transform_indices = @transform_3, window_bounds = array<i64: 128, 128>}, {pipeline_mode = #tpu.pipeline_mode<synchronous>, transform_indices = @transform_4, window_bounds = array<i64: 1, 128>}, {transform_indices = @transform_5, window_bounds = array<i64: 8, 128>}]} {
    %c0 = arith.constant 0 : index
    %c0_0 = arith.constant 0 : index
    %c0_1 = arith.constant 0 : index
    %0 = vector.load %arg1[%c0, %c0_0, %c0_1] : memref<8x16x32xf32, #tpu.memory_space<vmem>>, vector<8x16x32xf32>
    %1 = vector.shape_cast %0 : vector<8x16x32xf32> to vector<128x32xf32>
    %c0_2 = arith.constant 0 : index
    %c0_3 = arith.constant 0 : index
    %2 = vector.load %arg2[%c0_2, %c0_3] : memref<32x128xf32, #tpu.memory_space<vmem>>, vector<32x128xf32>
    %cst = arith.constant dense<0.000000e+00> : vector<128x128xf32>
    %3 = tpu.matmul %1, %2, %cst {dimension_numbers = #tpu.dot_dimension_numbers<[1], [0], [0], [1], [0, 0, 1, 1], [], []>} : vector<128x32xf32>, vector<32x128xf32>, vector<128x128xf32> -> vector<128x128xf32>
    %c127_i32 = arith.constant 127 : i32
    %4 = tpu.dynamic_rotate %3 by %c127_i32 dim 0 : vector<128x128xf32>, i32 -> vector<128x128xf32>
    %c116_i32 = arith.constant 116 : i32
    %5 = tpu.dynamic_rotate %4 by %c116_i32 dim 1 : vector<128x128xf32>, i32 -> vector<128x128xf32>
    %6 = arith.addf %3, %5 : vector<128x128xf32>
    %c126_i32 = arith.constant 126 : i32
    %7 = tpu.dynamic_rotate %3 by %c126_i32 dim 0 : vector<128x128xf32>, i32 -> vector<128x128xf32>
    %c104_i32 = arith.constant 104 : i32
    %8 = tpu.dynamic_rotate %7 by %c104_i32 dim 1 : vector<128x128xf32>, i32 -> vector<128x128xf32>
    %9 = arith.addf %6, %8 : vector<128x128xf32>
    %10 = vector.shape_cast %9 : vector<128x128xf32> to vector<8x16x128xf32>
    %11 = tpu.iota {dimensions = array<i32: 1>} : vector<8x16x128xi32>
    %c14_i32 = arith.constant 14 : i32
    %12 = vector.broadcast %c14_i32 : i32 to vector<8x16x128xi32>
    %13 = arith.cmpi slt, %11, %12 : vector<8x16x128xi32>
    %cst_4 = arith.constant 0xFF800000 : f32
    %14 = vector.broadcast %cst_4 : f32 to vector<8x16x128xf32>
    %15 = arith.select %13, %10, %14 : vector<8x16x128xi1>, vector<8x16x128xf32>
    %cst_5 = arith.constant dense<0xFF800000> : vector<8x128xf32>
    %16 = vector.multi_reduction <maximumf>, %15, %cst_5 [1] : vector<8x16x128xf32> to vector<8x128xf32>
    %c0_6 = arith.constant 0 : index
    %c0_7 = arith.constant 0 : index
    %17 = vector.load %arg3[%c0_6, %c0_7] : memref<1x128xf32, #tpu.memory_space<vmem>>, vector<1x128xf32>
    %18 = vector.broadcast %17 : vector<1x128xf32> to vector<8x128xf32>
    %19 = arith.addf %16, %18 : vector<8x128xf32>
    %c0_8 = arith.constant 0 : index
    %c0_9 = arith.constant 0 : index
    %20 = vector.load %arg4[%c0_8, %c0_9] : memref<128x128xf32, #tpu.memory_space<vmem>>, vector<128x128xf32>
    %cst_10 = arith.constant dense<0.000000e+00> : vector<8x128xf32>
    %21 = tpu.matmul %19, %20, %cst_10 {dimension_numbers = #tpu.dot_dimension_numbers<[1], [0], [0], [1], [0, 0, 1, 1], [], []>} : vector<8x128xf32>, vector<128x128xf32>, vector<8x128xf32> -> vector<8x128xf32>
    %c0_11 = arith.constant 0 : index
    %c0_12 = arith.constant 0 : index
    %22 = vector.load %arg5[%c0_11, %c0_12] : memref<1x128xf32, #tpu.memory_space<vmem>>, vector<1x128xf32>
    %23 = vector.broadcast %22 : vector<1x128xf32> to vector<8x128xf32>
    %24 = arith.addf %21, %23 : vector<8x128xf32>
    %c0_13 = arith.constant 0 : index
    %c0_14 = arith.constant 0 : index
    %25 = vector.load %arg6[%c0_13, %c0_14] : memref<8x128xf32, #tpu.memory_space<vmem>>, vector<8x128xf32>
    tpu.vector_store %arg6[%c0_13, %c0_14], %24 {strides = array<i32>} : memref<8x128xf32, #tpu.memory_space<vmem>>, vector<8x128xf32>,
    return
  }
  func.func @transform_0(%arg0: i32) -> (i32, i32, i32) {
    %c0_i32 = arith.constant 0 : i32
    %c0_i32_0 = arith.constant 0 : i32
    %c0_i32_1 = arith.constant 0 : i32
    return %arg0, %c0_i32, %c0_i32_0 : i32, i32, i32
  }
  func.func @transform_1(%arg0: i32) -> (i32, i32) {
    %c0_i32 = arith.constant 0 : i32
    %c0_i32_0 = arith.constant 0 : i32
    %c0_i32_1 = arith.constant 0 : i32
    return %c0_i32, %c0_i32_0 : i32, i32
  }
  func.func @transform_2(%arg0: i32) -> (i32, i32) {
    %c0_i32 = arith.constant 0 : i32
    %c0_i32_0 = arith.constant 0 : i32
    %c0_i32_1 = arith.constant 0 : i32
    return %c0_i32, %c0_i32_0 : i32, i32
  }
  func.func @transform_3(%arg0: i32) -> (i32, i32) {
    %c0_i32 = arith.constant 0 : i32
    %c0_i32_0 = arith.constant 0 : i32
    %c0_i32_1 = arith.constant 0 : i32
    return %c0_i32, %c0_i32_0 : i32, i32
  }
  func.func @transform_4(%arg0: i32) -> (i32, i32) {
    %c0_i32 = arith.constant 0 : i32
    %c0_i32_0 = arith.constant 0 : i32
    %c0_i32_1 = arith.constant 0 : i32
    return %c0_i32, %c0_i32_0 : i32, i32
  }
  func.func @transform_5(%arg0: i32) -> (i32, i32) {
    %c0_i32 = arith.constant 0 : i32
    %c0_i32_0 = arith.constant 0 : i32
    return %arg0, %c0_i32 : i32, i32
  }
}

</mosaic_0001>

<bundles_post_ra>
// kernel: bert_conv_head.1
= control target key start
LH: loop header
LB: loop body
LE: loop exit
PB: predicated region body
PF: predicated region fallthrough
CT: control target
= control target key end

     0   :  { %s825_s18 = smov 0   ;;  %s1192_s0 = inlined_call_operand.vmem [shape: f32[16,16,32], index: 0, kind: input, shape index: {}]   ;;  %s1193_s1 = inlined_call_operand.vmem [shape: f32[32,128], index: 1, kind: input, shape index: {}]   ;;  %s1194_s2 = inlined_call_operand.vmem [shape: f32[1,128], index: 2, kind: input, shape index: {}]   ;;  %s1195_s3 = inlined_call_operand.vmem [shape: f32[128,128], index: 3, kind: input, shape index: {}]   ;;  %s1196_s4 = inlined_call_operand.vmem [shape: f32[1,128], index: 4, kind: input, shape index: {}]   ;;  %s1197_s5 = inlined_call_operand.vmem [shape: f32[16,128], index: 5, kind: output, shape index: {}]  }
   0x1 LB: > { %s831_s19 = sadd.s32 4294967295, %s791_s18   ;;  %p741_p0 = scmp.ge.s32.totalorder %s791_s18, 1  ;;  %s791_s18 = sphi %s825_s18, %s15_s18  }
   0x2   : > { %p189_p1 = scmp.lt.s32.totalorder %s791_s18, 3 }
   0x4   : > { %p190_p2 = pnand %p741_p0, %p189_p1 }
   0x5   : > { %s742_s24 = sshll.u32 (!%p190_p2), %s831_s19, 3  ;;  %s793_s8 = smov (!%p190_p2), 116  }
   0x6   : > { %193 = sbr.rel (%p190_p2) target bundleno = 510 (0x1fe), region = 40  ;;  %p218_p3 = scmp.lt.s32.totalorder (!%p190_p2), %s742_s24, 15 }
   0x7   : > { %s794_s9 = smov (!%p190_p2), 104   ;;  %p224_p4 = scmp.lt.s32.totalorder (!%p190_p2), %s831_s19, 1 }
   0xb   : > { %v247_v0 = vld [vmem:[%s1193_s1 + $0x18] sm:$0xff]  ;;  %v246_v1 = vld [vmem:[%s1193_s1 + $0x10] sm:$0xff]  ;;  %v245_v2 = vld [vmem:[%s1193_s1 + $0x8] sm:$0xff]  ;;  %s1199_s24 = smov (!%p218_p3, %s742_s24), 15  ;;  %vm248_vm0 = vcmask 261120   ;;  %v378_v21 = vlaneseq  ;;  %vm642_vm4 = vcmask 1041409  }
   0xc   : > { %309 = vmatpush.msra.mxu0 %v247_v0  ;;  %765 = vmatpush.msra.mxu2 %v247_v0  ;;  %v244_v3 = vld [vmem:[%s1193_s1] sm:$0xff]  ;;  %s764_s29 = sshll.u32 %s1199_s24, 4  ;;  %vm645_vm5 = vcmask 1042434   ;;  %vm648_vm6 = vcmask 1043459   ;;  %vm651_vm7 = vcmask 1044484   ;;  %vm654_vm8 = vcmask 1045509  }
   0xd   : > { %766 = vmatpush.msra.mxu3 %v247_v0  ;;  %s851_s7 = scalar_lea.vmem %s1192_s0, %s764_s29  ;;  %v887_v22 = vshrl.u32 %v378_v21, 7  ;;  %vm657_vm9 = vcmask 1046534   ;;  %vm660_vm10 = vcmask 1047559   ;;  %s1201_s19 = smov (!%p224_p4, %s831_s19), 1 }
   0xe   : > { %310 = vmatpush.msra.mxu0 %v246_v1  ;;  %767 = vmatpush.msra.mxu2 %v246_v1  ;;  %v228_v4 = vld [vmem:[%s851_s7] sm:$0xff]  ;;  %v233_v5 = vld [vmem:[%s851_s7 + $0x28] sm:$0xff]  ;;  %v238_v6 = vld [vmem:[%s851_s7 + $0x50] sm:$0xff]  ;;  %s745_s23 = sshll.u32 %s1201_s19, 3 }
   0xf   : > { %768 = vmatpush.msra.mxu3 %v246_v1  ;;  %v229_v7 = vld [vmem:[%s851_s7 + $0x8] sm:$0xff]  ;;  %v234_v8 = vld [vmem:[%s851_s7 + $0x30] sm:$0xff]  ;;  %v239_v9 = vld [vmem:[%s851_s7 + $0x58] sm:$0xff]  ;;  %vm380_vm1 = vcmp.lt.s32.totalorder %v887_v22, 7  ;;  %vm461_vm2 = vcmp.lt.s32.totalorder %v887_v22, 6  ;;  %s227_s28 = scalar_lea.vmem %s1197_s5, %s745_s23 }
  0x10   : > { %311 = vmatpush.msra.mxu0 %v245_v2  ;;  %769 = vmatpush.msra.mxu2 %v245_v2  ;;  %v230_v10 = vld [vmem:[%s851_s7 + $0x10] sm:$0xff]  ;;  %v235_v11 = vld [vmem:[%s851_s7 + $0x38] sm:$0xff]  ;;  %v240_v12 = vld [vmem:[%s851_s7 + $0x60] sm:$0xff] }
  0x11   : > { %770 = vmatpush.msra.mxu3 %v245_v2  ;;  %v231_v13 = vld [vmem:[%s851_s7 + $0x18] sm:$0xff]  ;;  %v236_v14 = vld [vmem:[%s851_s7 + $0x40] sm:$0xff]  ;;  %v241_v15 = vld [vmem:[%s851_s7 + $0x68] sm:$0xff] }
  0x12   : > { %312 = vmatpush.msra.mxu0 %v244_v3  ;;  %771 = vmatpush.msra.mxu2 %v244_v3  ;;  %v232_v16 = vld [vmem:[%s851_s7 + $0x20] sm:$0xff]  ;;  %v237_v17 = vld [vmem:[%s851_s7 + $0x48] sm:$0xff]  ;;  %v242_v18 = vld [vmem:[%s851_s7 + $0x70] sm:$0xff] }
  0x13   : > { %772 = vmatpush.msra.mxu3 %v244_v3  ;;  %746 = vmatmul.msk.f32.vlgmr.msra.gmra.mxu0 %vm248_vm0, %v228_v4  ;;  %v243_v19 = vld [vmem:[%s851_s7 + $0x78] sm:$0xff] }
  0x14   : > { %751 = vmatmul.msk.f32.vlgmr.msra.gmra.mxu2 %vm248_vm0, %v233_v5  ;;  %756 = vmatmul.msk.f32.vlgmr.msra.gmra.mxu3 %vm248_vm0, %v238_v6 }
  0x1b   : > { %747 = vmatmul.msk.f32.gmra.mxu0 %vm248_vm0, %v229_v7 }
  0x1c   : > { %752 = vmatmul.msk.f32.gmra.mxu2 %vm248_vm0, %v234_v8  ;;  %757 = vmatmul.msk.f32.gmra.mxu3 %vm248_vm0, %v239_v9 }
  0x23   : > { %748 = vmatmul.msk.f32.gmra.mxu0 %vm248_vm0, %v230_v10 }
  0x24   : > { %753 = vmatmul.msk.f32.gmra.mxu2 %vm248_vm0, %v235_v11  ;;  %758 = vmatmul.msk.f32.gmra.mxu3 %vm248_vm0, %v240_v12 }
  0x2b   : > { %749 = vmatmul.msk.f32.gmra.mxu0 %vm248_vm0, %v231_v13 }
  0x2c   : > { %754 = vmatmul.msk.f32.gmra.mxu2 %vm248_vm0, %v236_v14  ;;  %759 = vmatmul.msk.f32.gmra.mxu3 %vm248_vm0, %v241_v15 }
  0x33   : > { %750 = vmatmul.msk.f32.gmra.mxu0 %vm248_vm0, %v232_v16 }
  0x34   : > { %755 = vmatmul.msk.f32.gmra.mxu2 %vm248_vm0, %v237_v17  ;;  %760 = vmatmul.msk.f32.gmra.mxu3 %vm248_vm0, %v242_v18 }
  0x3c   : > { %761 = vmatmul.msk.f32.gmra.mxu3 %vm248_vm0, %v243_v19 }
  0x90   : > { %v885_v20 = vpop.f32.mrf.mxu0 }
  0x91   : > { %v362_v26 = vrot.slane %v885_v20, 1  ;;  %v445_v37 = vrot.slane %v885_v20, 2 }
  0x97   : > { %v889_v23 = vpop.f32.mrf.mxu2  ;;  %v891_v24 = vpop.f32.mrf.mxu3 }
  0x98   : > { %v893_v25 = vpop.f32.mrf.mxu0  ;;  %v450_v29 = vrot.slane %v889_v23, 2  ;;  %v455_v33 = vrot.slane %v891_v24, 2  ;;  %v367_v41 = vrot.slane %v889_v23, 1  ;;  %v372_v46 = vrot.slane %v891_v24, 1 }
  0x99   : > { %v363_v27 = vrot.slane %v893_v25, 1  ;;  %v446_v30 = vrot.slane %v893_v25, 2 }
  0x9b   : > { %v395_v28 = vsel %vm380_vm1, %v362_v26, %v363_v27  ;;  %v476_v40 = vsel %vm461_vm2, %v445_v37, %v446_v30 }
  0x9c   : > { %397 = vrot.lane.b32.xlu1 %v395_v28, %s793_s8 }
  0x9f   : > { %v905_v31 = vpop.f32.mrf.mxu2  ;;  %v907_v32 = vpop.f32.mrf.mxu3 }
  0xa0   : > { %v451_v34 = vrot.slane %v905_v31, 2  ;;  %v456_v35 = vrot.slane %v907_v32, 2  ;;  %v912_v36 = vpop.f32.mrf.mxu0  ;;  %v368_v42 = vrot.slane %v905_v31, 1  ;;  %v373_v43 = vrot.slane %v907_v32, 1 }
  0xa1   : > { %v364_v48 = vrot.slane %v912_v36, 1  ;;  %v447_v53 = vrot.slane %v912_v36, 2 }
  0xa2   : > { %v466_v38 = vsel %vm461_vm2, %v455_v33, %v456_v35  ;;  %v471_v39 = vsel %vm461_vm2, %v450_v29, %v451_v34  ;;  %v390_v50 = vsel %vm380_vm1, %v367_v41, %v368_v42  ;;  %v385_v51 = vsel %vm380_vm1, %v372_v46, %v373_v43 }
  0xa3   : > { %498 = vrot.lane.b32.xlu0 %v466_v38, %s794_s9  ;;  %488 = vrot.lane.b32.xlu2 %v471_v39, %s794_s9  ;;  %v475_v58 = vsel %vm461_vm2, %v446_v30, %v447_v53  ;;  %v394_v59 = vsel %vm380_vm1, %v363_v27, %v364_v48 }
  0xa4   : > { %478 = vrot.lane.b32.xlu1 %v476_v40, %s794_s9 }
  0xa7   : > { %v930_v44 = vpop.f32.mrf.mxu2  ;;  %v932_v45 = vpop.f32.mrf.mxu3 }
  0xa8   : > { %v935_v47 = vpop.f32.mrf.mxu0  ;;  %v369_v61 = vrot.slane %v930_v44, 1  ;;  %v374_v62 = vrot.slane %v932_v45, 1  ;;  %v452_v8 = vrot.slane %v930_v44, 2  ;;  %v457_v9 = vrot.slane %v932_v45, 2 }
  0xa9   : > { %v365_v49 = vrot.slane %v935_v47, 1  ;;  %v448_v3 = vrot.slane %v935_v47, 2 }
  0xaa   : > { %v389_v4 = vsel %vm380_vm1, %v368_v42, %v369_v61  ;;  %v384_v5 = vsel %vm380_vm1, %v373_v43, %v374_v62  ;;  %v470_v12 = vsel %vm461_vm2, %v451_v34, %v452_v8  ;;  %v465_v14 = vsel %vm461_vm2, %v456_v35, %v457_v9 }
  0xab   : > { %417 = vrot.lane.b32.xlu2 %v385_v51, %s793_s8  ;;  %v393_v52 = vsel %vm380_vm1, %v364_v48, %v365_v49  ;;  %v474_v19 = vsel %vm461_vm2, %v447_v53, %v448_v3 }
  0xac   : > { %407 = vrot.lane.b32.xlu1 %v390_v50, %s793_s8  ;;  %401 = vrot.lane.b32.xlu0 %v393_v52, %s793_s8 }
  0xaf   : > { %v949_v54 = vpop.f32.mrf.mxu2  ;;  %v951_v55 = vpop.f32.mrf.mxu3 }
  0xb0   : > { %v953_v56 = vpop.f32.mrf.mxu0  ;;  %v370_v16 = vrot.slane %v949_v54, 1  ;;  %v453_v27 = vrot.slane %v949_v54, 2  ;;  %v375_v34 = vrot.slane %v951_v55, 1 }
  0xb1   : > { %v366_v57 = vrot.slane %v953_v56, 1  ;;  %v449_v63 = vrot.slane %v953_v56, 2 }
  0xb2   : > { %v388_v18 = vsel %vm380_vm1, %v369_v61, %v370_v16  ;;  %v383_v38 = vsel %vm380_vm1, %v374_v62, %v375_v34 }
  0xb3   : > { %480 = vrot.lane.b32.xlu2 %v475_v58, %s794_s9  ;;  %v392_v60 = vsel %vm380_vm1, %v365_v49, %v366_v57  ;;  %v473_v6 = vsel %vm461_vm2, %v448_v3, %v449_v63  ;;  %v472_v15 = vsel %vm461_vm2, %v449_v63, %v450_v29  ;;  %v391_v28 = vsel %vm380_vm1, %v366_v57, %v367_v41 }
  0xb4   : > { %399 = vrot.lane.b32.xlu1 %v394_v59, %s793_s8  ;;  %403 = vrot.lane.b32.xlu0 %v392_v60, %s793_s8  ;;  %v469_v29 = vsel %vm461_vm2, %v452_v8, %v453_v27  ;;  %v458_v41 = vrot.slane %v951_v55, 2 }
  0xb6   : > { %v464_v43 = vsel %vm461_vm2, %v457_v9, %v458_v41 }
  0xb7   : > { %v968_v0 = vpop.f32.mrf.mxu2  ;;  %v970_v1 = vpop.f32.mrf.mxu3 }
  0xb8   : > { %v454_v2 = vrot.slane %v968_v0, 2  ;;  %v371_v17 = vrot.slane %v968_v0, 1  ;;  %v376_v35 = vrot.slane %v970_v1, 1  ;;  %v459_v40 = vrot.slane %v970_v1, 2 }
  0xba   : > { %v467_v7 = vsel %vm461_vm2, %v454_v2, %v455_v33  ;;  %v386_v21 = vsel %vm380_vm1, %v371_v17, %v372_v46  ;;  %v387_v30 = vsel %vm380_vm1, %v370_v16, %v371_v17  ;;  %v382_v39 = vsel %vm380_vm1, %v375_v34, %v376_v35 }
  0xbb   : > { %409 = vrot.lane.b32.xlu2 %v389_v4, %s793_s8  ;;  %v468_v48 = vsel %vm461_vm2, %v453_v27, %v454_v2 }
  0xbc   : > { %419 = vrot.lane.b32.xlu1 %v384_v5, %s793_s8  ;;  %484 = vrot.lane.b32.xlu0 %v473_v6, %s794_s9  ;;  %v1068_v6 = vadd.s32 8, %v887_v22 }
  0xbe   : > { %vm528_vm3 = vcmp.lt.s32.totalorder %v1068_v6, 14 }
  0xbf   : > { %v987_v10 = vpop.f32.mrf.mxu3 }
  0xc0   : > { %v460_v11 = vrot.slane %v987_v10, 2  ;;  %v377_v33 = vrot.slane %v987_v10, 1 }
  0xc2   : > { %v477_v13 = vsel %vm461_vm2, %v460_v11, %v445_v37  ;;  %v396_v37 = vsel %vm380_vm1, %v377_v33, %v362_v26  ;;  %v381_v42 = vsel %vm380_vm1, %v376_v35, %v377_v33  ;;  %v463_v26 = vsel %vm461_vm2, %v458_v41, %v459_v40 }
  0xc3   : > { %490 = vrot.lane.b32.xlu2 %v470_v12, %s794_s9  ;;  %v462_v46 = vsel %vm461_vm2, %v459_v40, %v460_v11 }
  0xc4   : > { %500 = vrot.lane.b32.xlu1 %v465_v14, %s794_s9  ;;  %486 = vrot.lane.b32.xlu0 %v472_v15, %s794_s9 }
  0xcb   : > { %411 = vrot.lane.b32.xlu2 %v388_v18, %s793_s8 }
  0xcc   : > { %482 = vrot.lane.b32.xlu1 %v474_v19, %s794_s9  ;;  %415 = vrot.lane.b32.xlu0 %v386_v21, %s793_s8 }
  0xd3   : > { %405 = vrot.lane.b32.xlu2 %v391_v28, %s793_s8 }
  0xd4   : > { %492 = vrot.lane.b32.xlu1 %v469_v29, %s794_s9  ;;  %413 = vrot.lane.b32.xlu0 %v387_v30, %s793_s8 }
  0xdb   : > { %427 = vrot.lane.b32.xlu2 %v396_v37, %s793_s8  ;;  %v628_v37 = vld [vmem:[%s1195_s3 + $0x78] sm:$0xff] }
  0xdc   : > { %421 = vrot.lane.b32.xlu1 %v383_v38, %s793_s8  ;;  %423 = vrot.lane.b32.xlu0 %v382_v39, %s793_s8 }
  0xdd   : > { %663 = vmatpush.msra.mxu1 %v628_v37  ;;  %v616_v37 = vld [vmem:[%s1195_s3 + $0x18] sm:$0xff] }
  0xe3   : > { %425 = vrot.lane.b32.xlu2 %v381_v42, %s793_s8 }
  0xe4   : > { %504 = vrot.lane.b32.xlu1 %v463_v26, %s794_s9  ;;  %496 = vrot.lane.b32.xlu0 %v467_v7, %s794_s9  ;;  %v626_v26 = vld [vmem:[%s1195_s3 + $0x68] sm:$0xff] }
  0xeb   : > { %502 = vrot.lane.b32.xlu2 %v464_v43, %s794_s9 }
  0xec   : > { %506 = vrot.lane.b32.xlu1 %v462_v46, %s794_s9  ;;  %494 = vrot.lane.b32.xlu0 %v468_v48, %s794_s9 }
  0xf4   : > { %508 = vrot.lane.b32.xlu0 %v477_v13, %s794_s9 }
  0xfd   : > { %v489_v49 = vpop.permute.xlu2 %488 }
 0x105   : > { %v1057_v50 = vpop.permute.xlu2 %417 }
 0x10d   : > { %v481_v51 = vpop.permute.xlu2 %480 }
 0x10e   : > { %v398_v52 = vpop.permute.xlu1 %397 }
 0x10f   : > { %v429_v53 = vadd.f32 %v398_v52, %v885_v20 }
 0x115   : > { %v1060_v57 = vpop.permute.xlu2 %409  ;;  %v1062_v58 = vpop.permute.xlu0 %498 }
 0x116   : > { %v479_v59 = vpop.permute.xlu1 %478 }
 0x117   : > { %v510_v60 = vadd.f32 %v479_v59, %v429_v53 }
 0x11d   : > { %v1064_v61 = vpop.permute.xlu2 %490 }
 0x11e   : > { %v408_v62 = vpop.permute.xlu1 %407  ;;  %v402_v63 = vpop.permute.xlu0 %401 }
 0x11f   : > { %v434_v9 = vadd.f32 %v408_v62, %v889_v23  ;;  %v431_v28 = vadd.f32 %v402_v63, %v912_v36  ;;  %v627_v36 = vld [vmem:[%s1195_s3 + $0x70] sm:$0xff]  ;;  %v624_v62 = vld [vmem:[%s1195_s3 + $0x58] sm:$0xff] }
 0x120   : > { %664 = vmatpush.msra.mxu1 %v627_v36 }
 0x121   : > { %v515_v13 = vadd.f32 %v489_v49, %v434_v9  ;;  %v625_v49 = vld [vmem:[%s1195_s3 + $0x60] sm:$0xff] }
 0x122   : > { %665 = vmatpush.msra.mxu1 %v626_v26 }
 0x123   : > { %v534_v22 = vsel %vm528_vm3, %v515_v13, -inf  ;;  %v621_v13 = vld [vmem:[%s1195_s3 + $0x40] sm:$0xff] }
 0x124   : > { %666 = vmatpush.msra.mxu1 %v625_v49 }
 0x125   : > { %v412_v4 = vpop.permute.xlu2 %411 }
 0x126   : > { %v400_v2 = vpop.permute.xlu1 %399  ;;  %v404_v3 = vpop.permute.xlu0 %403  ;;  %v436_v43 = vadd.f32 %v412_v4, %v930_v44  ;;  %667 = vmatpush.msra.mxu1 %v624_v62  ;;  %v435_v4 = vadd.f32 %v1060_v57, %v905_v31 }
 0x127   : > { %v430_v5 = vadd.f32 %v400_v2, %v893_v25  ;;  %v432_v23 = vadd.f32 %v404_v3, %v935_v47  ;;  %v623_v3 = vld [vmem:[%s1195_s3 + $0x50] sm:$0xff] }
 0x128   : > { %668 = vmatpush.msra.mxu1 %v623_v3 }
 0x129   : > { %v511_v7 = vadd.f32 %v481_v51, %v430_v5 }
 0x12b   : > { %v530_v11 = vsel %vm528_vm3, %v511_v7, -inf }
 0x12c   : > { %v545_v14 = vmax.f32 %v510_v60, %v530_v11  ;;  %v622_v11 = vld [vmem:[%s1195_s3 + $0x48] sm:$0xff] }
 0x12d   : > { %v406_v12 = vpop.permute.xlu2 %405  ;;  %669 = vmatpush.msra.mxu1 %v622_v11 }
 0x12e   : > { %v420_v20 = vpop.permute.xlu1 %419  ;;  %v485_v8 = vpop.permute.xlu0 %484  ;;  %v433_v15 = vadd.f32 %v406_v12, %v953_v56  ;;  %v546_v18 = vrot.slane %v545_v14, 4 }
 0x12f   : > { %v513_v27 = vadd.f32 %v485_v8, %v432_v23  ;;  %v440_v44 = vadd.f32 %v420_v20, %v907_v32  ;;  %v516_v32 = vadd.f32 %v1064_v61, %v435_v4  ;;  %v1118_v20 = vld [vmem:[%s1194_s2] ss:$0 sm:$0xff]  ;;  %670 = vmatpush.msra.mxu1 %v621_v13  ;;  %v619_v23 = vld [vmem:[%s1195_s3 + $0x30] sm:$0xff] }
 0x130   : > { %v547_v29 = vmax.f32 %v545_v14, %v546_v18  ;;  %v439_v14 = vadd.f32 %v1057_v50, %v891_v24  ;;  %v620_v18 = vld [vmem:[%s1195_s3 + $0x38] sm:$0xff] }
 0x131   : > { %v532_v38 = vsel %vm528_vm3, %v513_v27, -inf  ;;  %671 = vmatpush.msra.mxu1 %v620_v18 }
 0x132   : > { %v548_v47 = vrot.slane %v547_v29, 2 }
 0x133   : > { %672 = vmatpush.msra.mxu1 %v619_v23 }
 0x134   : > { %v549_v46 = vmax.f32 %v547_v29, %v548_v47  ;;  %v618_v29 = vld [vmem:[%s1195_s3 + $0x28] sm:$0xff] }
 0x135   : > { %v1089_v41 = vpop.permute.xlu2 %427  ;;  %673 = vmatpush.msra.mxu1 %v618_v29 }
 0x136   : > { %v501_v16 = vpop.permute.xlu1 %500  ;;  %v487_v25 = vpop.permute.xlu0 %486  ;;  %v550_v63 = vrot.slane %v549_v46, 1 }
 0x137   : > { %v514_v17 = vadd.f32 %v487_v25, %v433_v15  ;;  %v521_v7 = vadd.f32 %v501_v16, %v440_v44 }
 0x138   : > { %v551_v31 = vmax.f32 %v549_v46, %v550_v63 }
 0x139   : > { %v559_v19 = vmax.f32 %v514_v17, %v534_v22  ;;  %v540_v17 = vsel %vm528_vm3, %v521_v7, -inf }
 0x13a   : > { %v605_v24 = vadd.f32 %v1118_v20, %v551_v31 }
 0x13b   : > { %v560_v21 = vrot.slane %v559_v19, 4 }
 0x13d   : > { %v561_v30 = vmax.f32 %v559_v19, %v560_v21  ;;  %v1120_v57 = vpop.permute.xlu2 %425  ;;  %v520_v19 = vadd.f32 %v1062_v58, %v439_v14  ;;  %v617_v58 = vld [vmem:[%s1195_s3 + $0x20] sm:$0xff] }
 0x13e   : > { %v483_v33 = vpop.permute.xlu1 %482  ;;  %v1079_v34 = vpop.permute.xlu0 %415  ;;  %674 = vmatpush.msra.mxu1 %v617_v58  ;;  %v443_v31 = vadd.f32 %v1120_v57, %v970_v1 }
 0x13f   : > { %v562_v56 = vrot.slane %v561_v30, 2  ;;  %v512_v35 = vadd.f32 %v483_v33, %v431_v28  ;;  %v580_v21 = vmax.f32 %v520_v19, %v540_v17 }
 0x140   : > { %675 = vmatpush.msra.mxu1 %v616_v37 }
 0x141   : > { %v552_v39 = vmax.f32 %v512_v35, %v532_v38  ;;  %v563_v40 = vmax.f32 %v561_v30, %v562_v56  ;;  %v581_v38 = vrot.slane %v580_v21, 4 }
 0x143   : > { %v553_v42 = vrot.slane %v552_v39, 4  ;;  %v564_v51 = vrot.slane %v563_v40, 1  ;;  %v582_v46 = vmax.f32 %v580_v21, %v581_v38 }
 0x145   : > { %v554_v48 = vmax.f32 %v552_v39, %v553_v42  ;;  %v565_v5 = vmax.f32 %v563_v40, %v564_v51  ;;  %v503_v40 = vpop.permute.xlu2 %502  ;;  %v583_v63 = vrot.slane %v582_v46, 2 }
 0x146   : > { %v493_v52 = vpop.permute.xlu1 %492  ;;  %v1098_v53 = vpop.permute.xlu0 %413 }
 0x147   : > { %v555_v59 = vrot.slane %v554_v48, 2  ;;  %v517_v60 = vadd.f32 %v493_v52, %v436_v43  ;;  %v607_v15 = vadd.f32 %v1118_v20, %v565_v5  ;;  %v614_v43 = vld [vmem:[%s1195_s3 + $0x8] sm:$0xff]  ;;  %v613_v52 = vld [vmem:[%s1195_s3] sm:$0xff]  ;;  %v584_v5 = vmax.f32 %v582_v46, %v583_v63 }
 0x149   : > { %v556_v2 = vmax.f32 %v554_v48, %v555_v59  ;;  %v536_v9 = vsel %vm528_vm3, %v517_v60, -inf  ;;  %v644_v27 = vrot.slane %v607_v15, 6  ;;  %v438_v48 = vadd.f32 %v1079_v34, %v968_v0 }
 0x14a   : > { %v566_v61 = vmax.f32 %v516_v32, %v536_v9  ;;  %v437_v60 = vadd.f32 %v1098_v53, %v949_v54  ;;  %v444_v9 = vadd.f32 %v1089_v41, %v987_v10  ;;  %v585_v53 = vrot.slane %v584_v5, 1 }
 0x14b   : > { %v557_v8 = vrot.slane %v556_v2, 1 }
 0x14c   : > { %v567_v28 = vrot.slane %v566_v61, 4 }
 0x14d   : > { %v558_v12 = vmax.f32 %v556_v2, %v557_v8 }
 0x14e   : > { %v422_v16 = vpop.permute.xlu1 %421  ;;  %v424_v25 = vpop.permute.xlu0 %423  ;;  %v568_v47 = vmax.f32 %v566_v61, %v567_v28 }
 0x14f   : > { %v606_v22 = vadd.f32 %v1118_v20, %v558_v12  ;;  %v441_v33 = vadd.f32 %v422_v16, %v932_v45  ;;  %v442_v35 = vadd.f32 %v424_v25, %v951_v55  ;;  %v615_v45 = vld [vmem:[%s1195_s3 + $0x10] sm:$0xff] }
 0x150   : > { %v569_v49 = vrot.slane %v568_v47, 2  ;;  %676 = vmatpush.msra.mxu1 %v615_v45 }
 0x151   : > { %v641_v50 = vrot.slane %v606_v22, 7  ;;  %v522_v26 = vadd.f32 %v503_v40, %v441_v33  ;;  %v586_v22 = vmax.f32 %v584_v5, %v585_v53 }
 0x152   : > { %677 = vmatpush.msra.mxu1 %v614_v43  ;;  %v570_v44 = vmax.f32 %v568_v47, %v569_v49 }
 0x153   : > { %v643_v30 = vsel %vm642_vm4, %v641_v50, %v605_v24  ;;  %v610_v57 = vadd.f32 %v1118_v20, %v586_v22 }
 0x154   : > { %v1146_v56 = vsel %vm645_vm5, %v644_v27, %v643_v30  ;;  %678 = vmatpush.msra.mxu1 %v613_v52  ;;  %v571_v7 = vrot.slane %v570_v44, 1 }
 0x155   : > { %v653_v30 = vrot.slane %v610_v57, 3 }
 0x156   : > { %v505_v39 = vpop.permute.xlu1 %504  ;;  %v497_v36 = vpop.permute.xlu0 %496  ;;  %v572_v12 = vmax.f32 %v570_v44, %v571_v7 }
 0x157   : > { %v523_v42 = vadd.f32 %v505_v39, %v442_v35  ;;  %v519_v59 = vadd.f32 %v497_v36, %v438_v48 }
 0x158   : > { %v608_v10 = vadd.f32 %v1118_v20, %v572_v12 }
 0x159   : > { %v542_v55 = vsel %vm528_vm3, %v523_v42, -inf  ;;  %v538_v0 = vsel %vm528_vm3, %v519_v59, -inf }
 0x15a   : > { %v587_v51 = vmax.f32 %v522_v26, %v542_v55  ;;  %v647_v23 = vrot.slane %v608_v10, 5 }
 0x15c   : > { %v588_v62 = vrot.slane %v587_v51, 4  ;;  %v649_v58 = vsel %vm648_vm6, %v647_v23, %v1146_v56  ;;  %v784_v56 = vld [vmem:[%s1196_s4] ss:$0 sm:$0xff] }
 0x15e   : > { %v495_v2 = vpop.permute.xlu0 %494  ;;  %v589_v34 = vmax.f32 %v587_v51, %v588_v62  ;;  %v507_v32 = vpop.permute.xlu1 %506 }
 0x15f   : > { %v518_v3 = vadd.f32 %v495_v2, %v437_v60  ;;  %v524_v61 = vadd.f32 %v507_v32, %v443_v31 }
 0x160   : > { %v590_v11 = vrot.slane %v589_v34, 2 }
 0x161   : > { %v573_v4 = vmax.f32 %v518_v3, %v538_v0 }
 0x162   : > { %v591_v16 = vmax.f32 %v589_v34, %v590_v11 }
 0x163   : > { %v574_v8 = vrot.slane %v573_v4, 4 }
 0x164   : > { %v592_v24 = vrot.slane %v591_v16, 1 }
 0x165   : > { %v575_v54 = vmax.f32 %v573_v4, %v574_v8 }
 0x166   : > { %v509_v13 = vpop.permute.xlu0 %508  ;;  %v593_v28 = vmax.f32 %v591_v16, %v592_v24 }
 0x167   : > { %v576_v14 = vrot.slane %v575_v54, 2  ;;  %v525_v15 = vadd.f32 %v509_v13, %v444_v9 }
 0x168   : > { %v611_v38 = vadd.f32 %v1118_v20, %v593_v28 }
 0x169   : > { %v577_v25 = vmax.f32 %v575_v54, %v576_v14  ;;  %v544_v17 = vsel %vm528_vm3, %v525_v15, -inf }
 0x16a   : > { %v594_v41 = vmax.f32 %v524_v61, %v544_v17  ;;  %v656_v36 = vrot.slane %v611_v38, 2 }
 0x16b   : > { %v578_v18 = vrot.slane %v577_v25, 1 }
 0x16c   : > { %v595_v19 = vrot.slane %v594_v41, 4 }
 0x16d   : > { %v579_v50 = vmax.f32 %v577_v25, %v578_v18 }
 0x16e   : > { %v596_v1 = vmax.f32 %v594_v41, %v595_v19 }
 0x16f   : > { %v609_v21 = vadd.f32 %v1118_v20, %v579_v50 }
 0x170   : > { %v597_v27 = vrot.slane %v596_v1, 2 }
 0x171   : > { %v650_v6 = vrot.slane %v609_v21, 4 }
 0x172   : > { %v598_v29 = vmax.f32 %v596_v1, %v597_v27 }
 0x173   : > { %v652_v33 = vsel %vm651_vm7, %v650_v6, %v649_v58 }
 0x174   : > { %v599_v35 = vrot.slane %v598_v29, 1  ;;  %v655_v37 = vsel %vm654_vm8, %v653_v30, %v652_v33 }
 0x175   : > { %v658_v42 = vsel %vm657_vm9, %v656_v36, %v655_v37 }
 0x176   : > { %v600_v47 = vmax.f32 %v598_v29, %v599_v35 }
 0x178   : > { %v612_v39 = vadd.f32 %v1118_v20, %v600_v47 }
 0x17a   : > { %v659_v40 = vrot.slane %v612_v39, 1 }
 0x17c   : > { %v661_v45 = vsel %vm660_vm10, %v659_v40, %v658_v42 }
 0x17d   : > { %679 = vmatmul.f32.vlgmr.msra.gmra.mxu1 %v661_v45 }
 0x1fa   : > { %v680_v26 = vpop.f32.mrf.mxu1 }
 0x1fb   : > { %v681_v20 = vadd.f32 %v784_v56, %v680_v26 }
 0x1fd   : > { %683 = vst [vmem:[%s227_s28] sm:$0xff] %v681_v20 }
 0x1fe PF: > { %s15_s18 = sadd.s32 1, %s791_s18  }
 0x1ff   : > { %p12_p5 = scmp.ge.s32.totalorder %s15_s18, 4  }
 0x201   :  { %14 = sbr.rel (!%p12_p5) target bundleno = 1 (0x1), region = 70 }

</bundles_post_ra>
